<compile_context>
chip_gen: v7x
topology: tpu7x:2x2x1
jax: 0.10.0
libtpu: 0.0.40
codegen_flags: <defaults>
</compile_context>

<pallas_src>
import jax
import jax.numpy as jnp
from jax.experimental import pallas as pl
from jax.experimental.pallas import tpu as pltpu


def _noise_copy_dma_kernel(noise_hbm_ref, out_hbm_ref, sem):
    # One full-array HBM -> HBM DMA.  Source and destination have identical
    # shape / dtype / layout, so this is a straight memcpy-class transfer at
    # the DMA roofline on every TPU generation.
    cp = pltpu.make_async_copy(noise_hbm_ref, out_hbm_ref, sem)
    cp.start()
    cp.wait()


def noise_forward(noise_param: jax.Array) -> jax.Array:
    """Pallas kernel path: materialize a copy of the parameter tensor.

    Single-invocation (grid-less) kernel: both refs stay in HBM
    (`memory_space=pl.ANY`) and one async DMA copies the whole array.
    Works for arbitrary shapes and dtypes (no lane-divisibility requirement),
    uses no VMEM beyond the DMA semaphore, and has no per-block step overhead.
    """
    return pl.pallas_call(
        _noise_copy_dma_kernel,
        out_shape=jax.ShapeDtypeStruct(noise_param.shape, noise_param.dtype),
        in_specs=[pl.BlockSpec(memory_space=pl.ANY)],
        out_specs=pl.BlockSpec(memory_space=pl.ANY),
        scratch_shapes=[pltpu.SemaphoreType.DMA(())],
    )(noise_param)


class NoisePallas:
    """Mirror of the PyTorch Noise module: holds a randn-initialized parameter."""

    def __init__(self, *dim, key):
        # torch.randn(*dim) equivalent: standard-normal init, deterministic key.
        self.noise = jax.random.normal(key, dim, dtype=jnp.float32)

    def __call__(self, materialize: bool = False):
        # forward() is an identity on the parameter: the fastest correct path
        # is to return it directly (no pallas_call launch, no HBM traffic).
        if not materialize:
            return self.noise
        # Optional explicit materializing copy via one HBM->HBM DMA.
        return noise_forward(self.noise)


if __name__ == "__main__":
    key = jax.random.PRNGKey(0)

    # Primary shape matching the module's typical NCHW-style use.
    module = NoisePallas(2, 4, 16, 16, key=key)

    # Fast path: no kernel, identity on the parameter (PyTorch forward()).
    fast = module()
    assert fast is module.noise

    # Kernel path: explicit copy via the single HBM->HBM DMA.
    out = jax.block_until_ready(module(materialize=True))
    assert out.shape == (2, 4, 16, 16)
    assert out.dtype == jnp.float32
    assert bool(jnp.array_equal(out, module.noise))

    # Larger parameter: same single-DMA path, still one kernel invocation.
    big = NoisePallas(8, 16, 64, 64, key=jax.random.PRNGKey(1))
    big_out = jax.block_until_ready(noise_forward(big.noise))
    assert big_out.shape == (8, 16, 64, 64)
    assert bool(jnp.array_equal(big_out, big.noise))

    # Shape whose element count is NOT a multiple of 128: previously this
    # silently returned the parameter; now the DMA path copies it too.
    odd = NoisePallas(2, 3, 5, 7, key=jax.random.PRNGKey(2))
    odd_out = jax.block_until_ready(noise_forward(odd.noise))
    assert odd_out.shape == (2, 3, 5, 7)
    assert bool(jnp.array_equal(odd_out, odd.noise))

    print("KERNEL_OK")
</pallas_src>

<mosaic_0001>
module attributes {stable_mosaic.version = 11 : i64} {
  func.func @_noise_copy_dma_kernel(%arg0: memref<2x4x16x16xf32, #tpu.memory_space<any>>, %arg1: memref<2x4x16x16xf32, #tpu.memory_space<any>>, %arg2: memref<!tpu.dma_semaphore, #tpu.memory_space<semaphore_mem>>) attributes {dimension_semantics = [], scalar_prefetch = 0 : i64, scratch_operands = 1 : i64, tpu.core_type = #tpu.core_type<tc>} {
    tpu.enqueue_dma source(%arg0 : memref<2x4x16x16xf32, #tpu.memory_space<any>>) target(%arg1 : memref<2x4x16x16xf32, #tpu.memory_space<any>>) target_semaphore(%arg2 : memref<!tpu.dma_semaphore, #tpu.memory_space<semaphore_mem>>)
    tpu.wait_dma2 semaphore(%arg2 : memref<!tpu.dma_semaphore, #tpu.memory_space<semaphore_mem>>) src(%arg0 : memref<2x4x16x16xf32, #tpu.memory_space<any>>) dst(%arg1 : memref<2x4x16x16xf32, #tpu.memory_space<any>>)
    return
  }
}

</mosaic_0001>

<bundles_post_ra>
// kernel: tpu_custom_call.1
= control target key start
LH: loop header
LB: loop body
LE: loop exit
PB: predicated region body
PF: predicated region fallthrough
CT: control target
= control target key end

     0   :  { %s36_s6 = smov [#allocation2]   ;;  %s37_s7 = smov [#allocation3]   ;;  %s55_s0 = inlined_call_operand.hbm [shape: f32[2,4,16,16], index: 0, kind: input, shape index: {}]   ;;  %s56_s1 = inlined_call_operand.hbm [shape: f32[2,4,16,16], index: 1, kind: output, shape index: {}]  }
   0x1   :  { %s38_s8 = smov 0  }
   0x2   :  { %18 = dma.general %s55_s0, 2048, %s56_s1, %s36_s6, %s37_s7, [#allocation4], %s38_s8, 0  }
   0x3   :  { %34 = dma.done.wait [#allocation2], 2048 }
   0x4   :  { %35 = vsyncadd [#allocation2], 4294965248 }
   0x5   :  { %24 = vsyncmov [#allocation2] }
   0x8   :  { %s25_s13 = vpop.sfrf %24 }
   0x9   :  { %p30_p0 = scmp.ne.s32.totalorder %s25_s13, 0 }
   0xb   :  { %29 = shalt.err (%p30_p0)  }

</bundles_post_ra>
